<compile_context>
chip_gen: v5e
topology: v5e:2x2
jax: 0.10.0
libtpu: 0.0.40
codegen_flags: <defaults>
</compile_context>

<pallas_src>
import functools

import jax
import jax.numpy as jnp
from jax.experimental import pallas as pl
from jax.experimental.pallas import tpu as pltpu

_LANE = 128


def _vmem_limit_bytes():
    """Generation-aware VMEM limit with headroom below physical capacity."""
    cap = 0
    try:
        cap = int(getattr(pltpu.get_tpu_info(), "vmem_capacity_bytes", 0))
    except Exception:  # pragma: no cover - defensive fallback
        cap = 0
    if cap <= 0:
        cap = 64 * 1024 * 1024  # conservative (v7x per-TC capacity)
    # ~75% of physical: ~96 MiB on v5e/v6e (128 MiB), ~48 MiB on v7x (64 MiB).
    return min((cap * 3) // 4, 96 * 1024 * 1024)


def _round_down_lane(v):
    return max(_LANE, (v // _LANE) * _LANE)


# ----------------------------------------------------------------------------
# Fully-fused kernel: pool + MLP + sigmoid + scale for one batch element.
# ----------------------------------------------------------------------------
def _fused_kernel(x_ref, w1_ref, w2_ref, o_ref, *, hw_true):
    # x_ref/o_ref: (1, C, HW) native dtype; w1_ref: (Cr, C) f32; w2_ref: (C, Cr) f32.
    xb = x_ref[0]                                        # (C, HW)
    xf = xb.astype(jnp.float32)
    s_sum = jnp.sum(xf, axis=-1, keepdims=True)          # (C, 1) f32
    s_max = jnp.max(xf, axis=-1, keepdims=True)          # (C, 1) f32

    # Shared MLP on [avg | max] packed as a (C, 2) tile -> one pair of dots.
    p = jnp.concatenate([s_sum * (1.0 / hw_true), s_max], axis=-1)   # (C, 2)
    h = jnp.maximum(
        jnp.dot(w1_ref[...], p, preferred_element_type=jnp.float32), 0.0)  # (Cr, 2)
    o = jnp.dot(w2_ref[...], h, preferred_element_type=jnp.float32)        # (C, 2)
    scale = jax.nn.sigmoid(o[:, 0:1] + o[:, 1:2]).astype(xb.dtype)         # (C, 1)

    o_ref[0] = xb * scale


# ----------------------------------------------------------------------------
# Fallback pass 1: streaming sum/max pooling over HW (ragged edge masked).
# ----------------------------------------------------------------------------
def _pool_kernel(x_ref, sum_ref, max_ref, acc_sum, acc_max, *,
                 tile_hw, hw_true, needs_mask):
    # x_ref: (1, c_tile, tile_hw) native; sum_ref/max_ref: (1, c_tile, 1) f32;
    # acc_sum/acc_max: (c_tile, 1) f32 VMEM scratch.
    hw_i = pl.program_id(2)
    num_hw = pl.num_programs(2)

    @pl.when(hw_i == 0)
    def _():
        acc_sum[...] = jnp.zeros_like(acc_sum)
        acc_max[...] = jnp.full_like(acc_max, -jnp.inf)

    xb = x_ref[0]                                        # (c_tile, tile_hw)

    if needs_mask:
        # Out-of-bounds lanes of a ragged edge block are undefined: exclude
        # them from BOTH the sum and the max.  (Cheap VPU work, hidden under
        # the streaming DMA.)
        lane = jax.lax.broadcasted_iota(jnp.int32, xb.shape, 1)
        valid = (hw_i * tile_hw + lane) < hw_true
        x_sum = jnp.where(valid, xb, jnp.zeros_like(xb))
        x_max = jnp.where(valid, xb, jnp.full_like(xb, -jnp.inf))
    else:
        x_sum = xb
        x_max = xb

    acc_sum[...] = acc_sum[...] + jnp.sum(
        x_sum.astype(jnp.float32), axis=-1, keepdims=True)
    acc_max[...] = jnp.maximum(
        acc_max[...], jnp.max(x_max, axis=-1, keepdims=True).astype(jnp.float32))

    @pl.when(hw_i == num_hw - 1)
    def _():
        sum_ref[0] = acc_sum[...]
        max_ref[0] = acc_max[...]


# ----------------------------------------------------------------------------
# Fallback pass 2: lane-dense elementwise scaling in the native dtype.
# ----------------------------------------------------------------------------
def _scale_kernel(x_ref, s_ref, o_ref):
    # x_ref/o_ref: (1, C, tile_hw); s_ref: (1, C, 1).  Ragged last tile is
    # handled by Pallas' edge store masking.
    o_ref[0] = x_ref[0] * s_ref[0]


def channel_attention(x, w1, w2, *, max_lane_tile=2048, force_two_pass=False):
    """x: (N, C, H, W); w1: (C//r, C); w2: (C, C//r). Returns (N, C, H, W)."""
    N, C, H, W = x.shape
    HW = H * W
    assert jnp.issubdtype(x.dtype, jnp.floating), "floating-point inputs only"
    Cr = w1.shape[0]

    xr = x.reshape(N, C, HW)
    w1f = w1.astype(jnp.float32)
    w2f = w2.astype(jnp.float32)

    itemsize = jnp.dtype(x.dtype).itemsize
    vmem_limit = _vmem_limit_bytes()
    budget = (vmem_limit * 3) // 4

    # ---------------- fully-fused path (2x|x| HBM traffic) ----------------
    # in + out double-buffered native slabs + one f32 temp for the mean.
    fused_bytes = C * HW * (4 * itemsize + 8) + 2 * Cr * C * 4 + (64 << 10)
    if fused_bytes <= budget and not force_two_pass:
        out = pl.pallas_call(
            functools.partial(_fused_kernel, hw_true=HW),
            out_shape=jax.ShapeDtypeStruct((N, C, HW), x.dtype),
            grid=(N,),
            in_specs=[pl.BlockSpec((1, C, HW), lambda n: (n, 0, 0)),
                      pl.BlockSpec((Cr, C), lambda n: (0, 0)),
                      pl.BlockSpec((C, Cr), lambda n: (0, 0))],
            out_specs=pl.BlockSpec((1, C, HW), lambda n: (n, 0, 0)),
            compiler_params=pltpu.CompilerParams(
                dimension_semantics=("parallel",),
                vmem_limit_bytes=vmem_limit),
        )(xr, w1f, w2f)
        return out.reshape(N, C, H, W)

    # ---------------- fallback: two streaming passes over HW --------------
    hw128 = pl.cdiv(HW, _LANE) * _LANE

    # Optional parallel C split: keeps both v7x TensorCores busy when N == 1
    # (a no-op on single-TC v5e/v6e).
    num_c = 2 if (N == 1 and C % 16 == 0 and C >= 16) else 1
    c_tile = C // num_c

    # --- pass 1: only the input block is double-buffered (+ f32 temps) ---
    tile1 = min(hw128, max_lane_tile,
                _round_down_lane(budget // (c_tile * (2 * itemsize + 8))))
    num_hw1 = pl.cdiv(HW, tile1)
    needs_mask1 = num_hw1 * tile1 != HW

    pooled_sum, pooled_max = pl.pallas_call(
        functools.partial(_pool_kernel, tile_hw=tile1, hw_true=HW,
                          needs_mask=needs_mask1),
        out_shape=(jax.ShapeDtypeStruct((N, C, 1), jnp.float32),
                   jax.ShapeDtypeStruct((N, C, 1), jnp.float32)),
        grid=(N, num_c, num_hw1),
        in_specs=[pl.BlockSpec((1, c_tile, tile1), lambda n, ci, h: (n, ci, h))],
        out_specs=(pl.BlockSpec((1, c_tile, 1), lambda n, ci, h: (n, ci, 0)),
                   pl.BlockSpec((1, c_tile, 1), lambda n, ci, h: (n, ci, 0))),
        scratch_shapes=[pltpu.VMEM((c_tile, 1), jnp.float32),
                        pltpu.VMEM((c_tile, 1), jnp.float32)],
        compiler_params=pltpu.CompilerParams(
            dimension_semantics=("parallel", "parallel", "arbitrary"),
            vmem_limit_bytes=vmem_limit),
    )(xr)

    # --- tiny shared MLP + sigmoid, batched over N and over {avg, max} ---
    avg = pooled_sum[:, :, 0] * (1.0 / HW)                # (N, C) f32
    mx = pooled_max[:, :, 0]                              # (N, C) f32
    p = jnp.concatenate([avg, mx], axis=0)                # (2N, C)
    h = jnp.maximum(p @ w1f.T, 0.0)                       # (2N, Cr)
    o = h @ w2f.T                                         # (2N, C)
    scale = jax.nn.sigmoid(o[:N] + o[N:]).astype(x.dtype)[:, :, None]  # (N, C, 1)

    # --- pass 2: in + out double-buffered -> factor-4 VMEM accounting ---
    tile2 = min(hw128, max_lane_tile,
                _round_down_lane(budget // (4 * C * itemsize)))
    num_hw2 = pl.cdiv(HW, tile2)

    out = pl.pallas_call(
        _scale_kernel,
        out_shape=jax.ShapeDtypeStruct((N, C, HW), x.dtype),
        grid=(N, num_hw2),
        in_specs=[pl.BlockSpec((1, C, tile2), lambda n, h: (n, 0, h)),
                  pl.BlockSpec((1, C, 1), lambda n, h: (n, 0, 0))],
        out_specs=pl.BlockSpec((1, C, tile2), lambda n, h: (n, 0, h)),
        compiler_params=pltpu.CompilerParams(
            dimension_semantics=("parallel", "parallel"),
            vmem_limit_bytes=vmem_limit),
    )(xr, scale)

    return out.reshape(N, C, H, W)


def channel_attention_ref(x, w1, w2):
    """Pure-JAX reference mirroring the PyTorch forward."""
    avg = jnp.mean(x, axis=(2, 3))                        # (N, C)
    mx = jnp.max(x, axis=(2, 3))                          # (N, C)

    def mlp(p):                                           # p: (N, C)
        h = jnp.maximum(p @ w1.T, 0.0)                    # (N, Cr)
        return h @ w2.T                                   # (N, C)

    scale = jax.nn.sigmoid(mlp(avg) + mlp(mx))[:, :, None, None]
    return x * scale


if __name__ == "__main__":
    # in_planes must be a multiple of reduction_ratio=16, so C=32 -> hidden=2.
    N, C, H, W = 2, 32, 16, 16
    reduction_ratio = 16
    Cr = C // reduction_ratio

    key = jax.random.PRNGKey(0)
    kx, kw1, kw2 = jax.random.split(key, 3)
    x = jax.random.normal(kx, (N, C, H, W), dtype=jnp.float32)
    # Deterministic synthetic 1x1-conv weights (bias=False in the module).
    w1 = jax.random.normal(kw1, (Cr, C), dtype=jnp.float32) * (1.0 / jnp.sqrt(C))
    w2 = jax.random.normal(kw2, (C, Cr), dtype=jnp.float32) * (1.0 / jnp.sqrt(Cr))

    # Fused path (default for this small feature map).
    out = jax.block_until_ready(channel_attention(x, w1, w2))
    ref = channel_attention_ref(x, w1, w2)
    assert out.shape == (N, C, H, W)
    assert jnp.allclose(out, ref, atol=1e-5, rtol=1e-5), "fused path mismatch"

    # Fallback two-pass path with a ragged HW edge (HW=400, tiles of 128) and
    # the v7x-style parallel C split (N=1), to keep that path exercised.
    x2 = jax.random.normal(kx, (1, C, 20, 20), dtype=jnp.float32)
    out2 = jax.block_until_ready(
        channel_attention(x2, w1, w2, max_lane_tile=128, force_two_pass=True))
    ref2 = channel_attention_ref(x2, w1, w2)
    assert jnp.allclose(out2, ref2, atol=1e-5, rtol=1e-5), "two-pass mismatch"

    print("KERNEL_OK")
</pallas_src>

<mosaic_0001>
module attributes {stable_mosaic.version = 11 : i64} {
  func.func @_fused_kernel(%arg0: i32, %arg1: memref<1x32x256xf32, #tpu.memory_space<vmem>>, %arg2: memref<2x32xf32, #tpu.memory_space<vmem>>, %arg3: memref<32x2xf32, #tpu.memory_space<vmem>>, %arg4: memref<1x32x256xf32, #tpu.memory_space<vmem>>) attributes {dimension_semantics = [#tpu.dimension_semantics<parallel>], iteration_bounds = array<i64: 2>, scalar_prefetch = 0 : i64, scratch_operands = 0 : i64, tpu.core_type = #tpu.core_type<tc>, window_params = [{transform_indices = @transform_0, window_bounds = array<i64: 1, 32, 256>}, {pipeline_mode = #tpu.pipeline_mode<synchronous>, transform_indices = @transform_1, window_bounds = array<i64: 2, 32>}, {pipeline_mode = #tpu.pipeline_mode<synchronous>, transform_indices = @transform_2, window_bounds = array<i64: 32, 2>}, {transform_indices = @transform_3, window_bounds = array<i64: 1, 32, 256>}]} {
    %c0 = arith.constant 0 : index
    %c0_0 = arith.constant 0 : index
    %c0_1 = arith.constant 0 : index
    %0 = vector.load %arg1[%c0, %c0_0, %c0_1] : memref<1x32x256xf32, #tpu.memory_space<vmem>>, vector<1x32x256xf32>
    %1 = vector.shape_cast %0 : vector<1x32x256xf32> to vector<32x256xf32>
    %cst = arith.constant dense<0.000000e+00> : vector<32xf32>
    %2 = vector.multi_reduction <add>, %1, %cst [1] : vector<32x256xf32> to vector<32xf32>
    %3 = vector.shape_cast %2 : vector<32xf32> to vector<32x1xf32>
    %cst_2 = arith.constant dense<0xFF800000> : vector<32xf32>
    %4 = vector.multi_reduction <maximumf>, %1, %cst_2 [1] : vector<32x256xf32> to vector<32xf32>
    %5 = vector.shape_cast %4 : vector<32xf32> to vector<32x1xf32>
    %cst_3 = arith.constant 3.906250e-03 : f32
    %6 = vector.broadcast %cst_3 : f32 to vector<32x1xf32>
    %7 = arith.mulf %3, %6 : vector<32x1xf32>
    %8 = tpu.concatenate %7, %5 in 1 : vector<32x1xf32>, vector<32x1xf32> -> vector<32x2xf32>
    %c0_4 = arith.constant 0 : index
    %c0_5 = arith.constant 0 : index
    %9 = vector.load %arg2[%c0_4, %c0_5] : memref<2x32xf32, #tpu.memory_space<vmem>>, vector<2x32xf32>
    %cst_6 = arith.constant dense<0.000000e+00> : vector<2x2xf32>
    %10 = tpu.matmul %9, %8, %cst_6 {dimension_numbers = #tpu.dot_dimension_numbers<[1], [0], [0], [1], [0, 0, 1, 1], [], []>} : vector<2x32xf32>, vector<32x2xf32>, vector<2x2xf32> -> vector<2x2xf32>
    %cst_7 = arith.constant 0.000000e+00 : f32
    %11 = vector.broadcast %cst_7 : f32 to vector<2x2xf32>
    %12 = arith.maximumf %10, %11 : vector<2x2xf32>
    %c0_8 = arith.constant 0 : index
    %c0_9 = arith.constant 0 : index
    %13 = vector.load %arg3[%c0_8, %c0_9] : memref<32x2xf32, #tpu.memory_space<vmem>>, vector<32x2xf32>
    %cst_10 = arith.constant dense<0.000000e+00> : vector<32x2xf32>
    %14 = tpu.matmul %13, %12, %cst_10 {dimension_numbers = #tpu.dot_dimension_numbers<[1], [0], [0], [1], [0, 0, 1, 1], [], []>} : vector<32x2xf32>, vector<2x2xf32>, vector<32x2xf32> -> vector<32x2xf32>
    %15 = vector.extract_strided_slice %14 {offsets = [0, 0], sizes = [32, 1], strides = [1, 1]} : vector<32x2xf32> to vector<32x1xf32>
    %16 = vector.extract_strided_slice %14 {offsets = [0, 1], sizes = [32, 1], strides = [1, 1]} : vector<32x2xf32> to vector<32x1xf32>
    %17 = arith.addf %15, %16 : vector<32x1xf32>
    %18 = arith.negf %17 : vector<32x1xf32>
    %19 = math.exp %18 : vector<32x1xf32>
    %cst_11 = arith.constant 1.000000e+00 : f32
    %20 = vector.broadcast %cst_11 : f32 to vector<32x1xf32>
    %21 = arith.addf %20, %19 : vector<32x1xf32>
    %22 = arith.divf %20, %21 : vector<32x1xf32>
    %23 = vector.broadcast %22 : vector<32x1xf32> to vector<32x256xf32>
    %24 = arith.mulf %1, %23 : vector<32x256xf32>
    %c0_12 = arith.constant 0 : index
    %c0_13 = arith.constant 0 : index
    %c0_14 = arith.constant 0 : index
    %25 = vector.load %arg4[%c0_12, %c0_13, %c0_14] : memref<1x32x256xf32, #tpu.memory_space<vmem>>, vector<1x32x256xf32>
    %26 = vector.shape_cast %25 : vector<1x32x256xf32> to vector<32x256xf32>
    %27 = vector.shape_cast %24 : vector<32x256xf32> to vector<1x32x256xf32>
    tpu.vector_store %arg4[%c0_12, %c0_13, %c0_14], %27 {strides = array<i32>} : memref<1x32x256xf32, #tpu.memory_space<vmem>>, vector<1x32x256xf32>,
    return
  }
  func.func @transform_0(%arg0: i32) -> (i32, i32, i32) {
    %c0_i32 = arith.constant 0 : i32
    %c0_i32_0 = arith.constant 0 : i32
    %c0_i32_1 = arith.constant 0 : i32
    return %arg0, %c0_i32, %c0_i32_0 : i32, i32, i32
  }
  func.func @transform_1(%arg0: i32) -> (i32, i32) {
    %c0_i32 = arith.constant 0 : i32
    %c0_i32_0 = arith.constant 0 : i32
    %c0_i32_1 = arith.constant 0 : i32
    return %c0_i32, %c0_i32_0 : i32, i32
  }
  func.func @transform_2(%arg0: i32) -> (i32, i32) {
    %c0_i32 = arith.constant 0 : i32
    %c0_i32_0 = arith.constant 0 : i32
    %c0_i32_1 = arith.constant 0 : i32
    return %c0_i32, %c0_i32_0 : i32, i32
  }
  func.func @transform_3(%arg0: i32) -> (i32, i32, i32) {
    %c0_i32 = arith.constant 0 : i32
    %c0_i32_0 = arith.constant 0 : i32
    %c0_i32_1 = arith.constant 0 : i32
    return %arg0, %c0_i32, %c0_i32_0 : i32, i32, i32
  }
}

</mosaic_0001>

<bundles_post_ra>
// kernel: tpu_custom_call.1
= control target key start
LH: loop header
LB: loop body
LE: loop exit
PB: predicated region body
PF: predicated region fallthrough
CT: control target
= control target key end

     0   :  { %8 = vsyncpa [#allocation3], 0  ;;  %s942_s0 = inlined_call_operand.hbm [shape: f32[2,32,256], index: 0, kind: input, shape index: {}]   ;;  %s943_s1 = inlined_call_operand.vmem [shape: f32[2,32], index: 1, kind: input, shape index: {}]   ;;  %s944_s2 = inlined_call_operand.vmem [shape: f32[32,2], index: 2, kind: input, shape index: {}]   ;;  %s945_s3 = inlined_call_operand.hbm [shape: f32[2,32,256], index: 3, kind: output, shape index: {}]  }
   0x1   :  { %10 = vsyncpa [#allocation3 + $0x1], 0 }
   0x2   :  { %11 = vsyncpa [#allocation4], 0 }
   0x3   :  { %13 = vsyncpa [#allocation4 + $0x1], 0  ;;  %s752_s12 = smov 0   ;;  %s754_s13 = smov 0  }
   0x4   :  { %s756_s14 = smov 0   ;;  %s758_s15 = smov 0  }
   0x5 LB: > { %s773_s16 = sadd.s32 4294967295, %s724_s15   ;;  %s529_s17 = sadd.s32 4294967294, %s724_s15   ;;  %s724_s15 = sphi %s758_s15, %s955_s15   ;;  %s720_s14 = sphi %s756_s14, %s954_s14   ;;  %s716_s13 = sphi %s754_s13, %s953_s13   ;;  %s712_s12 = sphi %s752_s12, %s952_s12  }
   0x6   : > { %s777_s18 = sadd.s32 1, %s724_s15   ;;  %s26_s19 = sadd.s32 1, %s720_s14 }
   0x7   : > { %s23_s20 = ssub.s32 %s724_s15, %s777_s18  ;;  %p33_p0 = scmp.ne.s32.totalorder %s720_s14, %s716_s13 }
   0x8   : > { %p24_p1 = scmp.eq.s32.totalorder %s23_s20, 0  ;;  %p34_p2 = scmp.eq.s32.totalorder %s724_s15, 0 }
   0x9   : > { %p39_p3 = scmp.ne.s32.totalorder %s716_s13, %s712_s12  ;;  %p40_p4 = scmp.eq.s32.totalorder %s773_s16, 0 }
   0xa   : > { %s789_s21 = scalar_select %p24_p1, %s720_s14, %s26_s19  }
   0xb   : > { %p791_p5 = por %p34_p2, %p33_p0  ;;  %p795_p6 = por %p40_p4, %p39_p3 }
   0xc   : > { %p105_p7 = scmp.eq.s32.totalorder %s773_s16, 1  ;;  %p111_p8 = scmp.eq.s32.totalorder %s529_s17, 1 }
   0xd   : > { %p569_p10 = scmp.lt.s32.totalorder %s724_s15, 2  ;;  %s137_s26 = sand.u32 1, %s720_s14  }
   0xe   : > { %p802_p11 = por %p105_p7, %p33_p0  ;;  %p806_p12 = por %p111_p8, %p39_p3 }
   0xf   : > { %s553_s27 = sshll.u32 %s724_s15, 6  ;;  %s532_s28 = sshll.u32 %s137_s26, 6 }
  0x10   : > { %s146_s4 = scalar_lea.hbm %s942_s0, %s553_s27  ;;  %s141_s6 = scalar_lea.vmem [#allocation2], %s532_s28 }
  0x11   : > { %s147_s5 = sshll.u32 %s146_s4, 4  ;;  %s149_s7 = sshll.u32 %s141_s6, 4  ;;  %s148_s5 = int_to_ptr.hbm [resolvable:$true] %s147_s5  ;;  %s150_s7 = int_to_ptr.vmem [resolvable:$true] %s149_s7 }
  0x12   : > { %p817_p13 = pnand %p569_p10, %p791_p5  ;;  %p535_p0 = scmp.ge.s32.totalorder %s724_s15, 1 }
  0x13   : > { %p157_p1 = scmp.lt.s32.totalorder %s724_s15, 3  ;;  %s138_s9 = scalar_lea.sflag [#allocation3], %s137_s26 }
  0x14   : > { %s628_s10 = sshra.s32 %s148_s5, 4  ;;  %p632_p3 = pneg %p817_p13  ;;  %s629_s10 = int_to_ptr.hbm [resolvable:$true] %s628_s10 }
  0x15   : > { %s630_s11 = scalar_lea.hbm %s629_s10, 64  ;;  %s635_s20 = scalar_lea.hbm %s942_s0, 128 }
  0x16   : > { %p631_p2 = scmp.ne.s32.totalorder %s629_s10, %s630_s11  ;;  %p636_p5 = scmp.lt.s32.totalorder %s629_s10, %s942_s0 }
  0x17   : > { %p637_p8 = scmp.lt.s32.totalorder %s635_s20, %s630_s11 }
  0x18   : > { %p633_p4 = pnand %p632_p3, %p631_p2 }
  0x19   : > { %p638_p10 = por %p637_p8, %p636_p5 }
  0x1a   : > { %p634_p7 = pneg %p633_p4 }
  0x1c   : > { %p639_p9 = pnand %p638_p10, %p634_p7 }
  0x1e   : > { %642 = shalt.err (!%p639_p9)
}
  0x1f   : > { %s726_s26 = smov 256   ;;  %s727_s28 = smov 16  }
  0x20   : > { %564 = dma.hbm_to_vmem [thread:$0]  (!%p817_p13), %s148_s5, 1024, %s150_s7, %s138_s9, %s726_s26, %s726_s26, %s727_s28  }
  0x21   : > { %p158_p2 = pnand %p535_p0, %p157_p1 }
  0x22   : > { %s838_s29 = sand.u32 (!%p158_p2), 1, %s716_s13  }
  0x23   : > { %161 = sbr.rel (%p158_p2) target bundleno = 717 (0x2cd), region = 32  ;;  %s536_s30 = sshll.u32 (!%p158_p2), %s838_s29, 6 }
  0x24   : > { %s164_s4 = scalar_lea.sflag (!%p158_p2), [#allocation3], %s838_s29  ;;  %s167_s6 = scalar_lea.vmem (!%p158_p2), [#allocation2], %s536_s30 }
  0x28   : > { %703 = dma.done.wait (%p795_p6), %s164_s4, 1024  }
  0x29   : > { %705 = vsyncadd (%p795_p6), %s164_s4, 4294966272  ;;  %v848_v0 = vld [vmem:[%s167_s6 + $0x30] sm:$0xff]  ;;  %v850_v1 = vld [vmem:[%s167_s6 + $0x38] sm:$0xff]  ;;  %vm227_vm0 = vcmask 7168   ;;  %vm233_vm1 = vcmask 261120   ;;  %vm275_vm2 = vcmask 1041408  }
  0x2a   : > { %v852_v2 = vld [vmem:[%s167_s6 + $0x20] sm:$0xff]  ;;  %v208_v3 = vadd.f32 %v850_v1, %v848_v0  ;;  %v220_v4 = vmax.f32 %v848_v0, %v850_v1  ;;  %v858_v5 = vld [vmem:[%s167_s6 + $0x28] sm:$0xff]  ;;  %v862_v7 = vld [vmem:[%s167_s6 + $0x10] sm:$0xff]  ;;  %vm262_vm3 = vcmask 15360   ;;  %s728_s22 = smov 127   ;;  %v729_v43 = vmov 0  }
  0x2b   : > { %v217_v6 = vmax.f32 %v852_v2, %v858_v5  ;;  %v864_v8 = vld [vmem:[%s167_s6 + $0x18] sm:$0xff]  ;;  %v866_v9 = vld [vmem:[%s167_s6] sm:$0xff]  ;;  %v868_v10 = vld [vmem:[%s167_s6 + $0x8] sm:$0xff]  ;;  %v205_v11 = vadd.f32 %v858_v5, %v852_v2  ;;  %609 = vset.pattern.permute.xlu0 %v729_v43  ;;  %610 = vset.pattern.permute.xlu2 %v729_v43  ;;  %s190_s27 = scalar_lea.vmem [#allocation5], %s536_s30  ;;  %s554_s26 = sshll.u32 %s773_s16, 6 }
  0x2c   : > { %209 = vadd.xlane.f32.xlu0 %v208_v3  ;;  %221 = vmax.xlane.f32.xlu1 %v220_v4  ;;  %v202_v12 = vadd.f32 %v864_v8, %v862_v7  ;;  %v199_v13 = vadd.f32 %v868_v10, %v866_v9  ;;  %v214_v14 = vmax.f32 %v862_v7, %v864_v8  ;;  %v232_v32 = vld [vmem:[%s943_s1] sm:$0x3]  ;;  %v259_v36 = vld [vmem:[%s944_s2 + $0x8] sm:$0xff]  ;;  %v261_v37 = vld [vmem:[%s944_s2 + $0x18] sm:$0xff]  ;;  %s452_s4 = scalar_lea.hbm %s945_s3, %s554_s26  ;;  %s453_s6 = sshll.u32 %s190_s27, 4  ;;  %s454_s6 = int_to_ptr.vmem [resolvable:$true] %s453_s6 }
  0x2d   : > { %218 = vmax.xlane.f32.xlu2 %v217_v6  ;;  %v211_v15 = vmax.f32 %v866_v9, %v868_v10  ;;  %v258_v35 = vld [vmem:[%s944_s2] sm:$0xff]  ;;  %v260_v38 = vld [vmem:[%s944_s2 + $0x10] sm:$0xff]  ;;  %611 = vset.pattern.permute.xlu1 %v729_v43  ;;  %s455_s23 = sshll.u32 %s452_s4, 4  ;;  %s441_s5 = scalar_lea.sflag [#allocation4], %s838_s29  ;;  %s456_s23 = int_to_ptr.hbm [resolvable:$true] %s455_s23 }
  0x2e   : > { %s672_s7 = sshra.s32 %s456_s23, 4  ;;  %s678_s10 = scalar_lea.hbm %s945_s3, 128  ;;  %s673_s7 = int_to_ptr.hbm [resolvable:$true] %s672_s7 }
  0x2f   : > { %s674_s16 = scalar_lea.hbm %s673_s7, 64  ;;  %p679_p0 = scmp.lt.s32.totalorder %s673_s7, %s945_s3 }
  0x30   : > { %p675_p6 = scmp.ne.s32.totalorder %s673_s7, %s674_s16  ;;  %p680_p1 = scmp.lt.s32.totalorder %s678_s10, %s674_s16 }
  0x32   : > { %p676_p9 = pnand %p675_p6, %p802_p11  ;;  %p681_p3 = por %p680_p1, %p679_p0 }
  0x34   : > { %206 = vadd.xlane.f32.xlu0 %v205_v11  ;;  %203 = vadd.xlane.f32.xlu1 %v202_v12  ;;  %p677_p13 = pneg %p676_p9 }
  0x35   : > { %200 = vadd.xlane.f32.xlu2 %v199_v13 }
  0x36   : > { %p682_p4 = pnand %p681_p3, %p677_p13 }
  0x3c   : > { %215 = vmax.xlane.f32.xlu0 %v214_v14  ;;  %212 = vmax.xlane.f32.xlu1 %v211_v15 }
  0x9f   : > { %v210_v16 = vpop.xlane.xlu0 %209  ;;  %v222_v17 = vpop.xlane.xlu1 %221 }
  0xa0   : > { %v226_v18 = vmul.f32 0.00390625, %v210_v16  ;;  %v219_v19 = vpop.xlane.xlu2 %218 }
  0xa2   : > { %v231_v20 = vsel %vm227_vm0, %v226_v18, %v222_v17 }
  0xa3   : > { %249 = vmatpush.msra.mxu0 %v231_v20 }
  0xa7   : > { %v207_v21 = vpop.xlane.xlu0 %206  ;;  %v204_v22 = vpop.xlane.xlu1 %203 }
  0xa8   : > { %v225_v23 = vmul.f32 0.00390625, %v207_v21  ;;  %v201_v24 = vpop.xlane.xlu2 %200  ;;  %v224_v27 = vmul.f32 0.00390625, %v204_v22 }
  0xa9   : > { %v223_v26 = vmul.f32 0.00390625, %v201_v24 }
  0xaa   : > { %v230_v25 = vsel %vm227_vm0, %v225_v23, %v219_v19 }
  0xab   : > { %250 = vmatpush.msra.mxu0 %v230_v25 }
  0xaf   : > { %v216_v28 = vpop.xlane.xlu0 %215  ;;  %v213_v29 = vpop.xlane.xlu1 %212 }
  0xb0   : > { %v229_v30 = vsel %vm227_vm0, %v224_v27, %v216_v28  ;;  %v228_v31 = vsel %vm227_vm0, %v223_v26, %v213_v29 }
  0xb1   : > { %251 = vmatpush.msra.mxu0 %v229_v30 }
  0xb3   : > { %252 = vmatpush.msra.mxu0 %v228_v31 }
  0xb4   : > { %538 = vmatmul.msk.f32.vlgmr.msra.gmra.mxu0 %vm233_vm1, %v232_v32 }
 0x131   : > { %v254_v33 = vpop.f32.mrf.mxu0 }
 0x132   : > { %v257_v34 = vmax.f32 %v254_v33, 0.0 }
 0x134   : > { %539 = vmatpush.msk.msra.mxu1 %vm275_vm2, %v257_v34  ;;  %555 = vmatpush.msk.msra.mxu2 %vm275_vm2, %v257_v34 }
 0x135   : > { %556 = vmatpush.msk.msra.mxu3 %vm275_vm2, %v257_v34  ;;  %540 = vmatmul.msk.f32.vlgmr.msra.gmra.mxu1 %vm262_vm3, %v258_v35 }
 0x136   : > { %541 = vmatmul.msk.f32.vlgmr.msra.gmra.mxu2 %vm262_vm3, %v259_v36  ;;  %543 = vmatmul.msk.f32.vlgmr.msra.gmra.mxu3 %vm262_vm3, %v261_v37 }
 0x13e   : > { %542 = vmatmul.msk.f32.gmra.mxu2 %vm262_vm3, %v260_v38 }
 0x1b2   : > { %v296_v39 = vpop.f32.mrf.mxu1 }
 0x1b3   : > { %312 = vrot.lane.b32.xlu2 %v296_v39, %s728_s22 }
 0x1b9   : > { %v299_v40 = vpop.f32.mrf.mxu2  ;;  %v305_v41 = vpop.f32.mrf.mxu3 }
 0x1ba   : > { %314 = vrot.lane.b32.xlu0 %v299_v40, %s728_s22 }
 0x1bb   : > { %318 = vrot.lane.b32.xlu2 %v305_v41, %s728_s22 }
 0x1c1   : > { %v302_v42 = vpop.f32.mrf.mxu2 }
 0x1c2   : > { %316 = vrot.lane.b32.xlu1 %v302_v42, %s728_s22 }
 0x20d   : > { %v313_v44 = vpop.permute.xlu2 %312 }
 0x20e   : > { %v324_v45 = vadd.f32 %v313_v44, %v296_v39 }
 0x210   : > { %v544_v46 = vmul.f32 -1.442695, %v324_v45 }
 0x212   : > { %612 = vpow2.f32 %v544_v46 }
 0x215   : > { %v319_v49 = vpop.permute.xlu2 %318 }
 0x216   : > { %v327_v51 = vadd.f32 %v319_v49, %v305_v41 }
 0x218   : > { %v613_v47 = vpop.eup %612  ;;  %v547_v54 = vmul.f32 -1.442695, %v327_v51 }
 0x219   : > { %v340_v48 = vadd.f32 1.0, %v613_v47 }
 0x21b   : > { %614 = vrcp.f32 %v340_v48  ;;  %v355_v55 = vand.u32 2147483648, %v340_v48  ;;  %v353_v57 = vand.u32 2147483647, %v340_v48  ;;  %vm349_vm5 = vweird.f32 %v340_v48 }
 0x21c   : > { %616 = vpow2.f32 %v547_v54 }
 0x21d   : > { %v356_v59 = vor.u32 1.1754944e-38, %v355_v55  ;;  %vm354_vm7 = vcmp.eq.f32.partialorder %v353_v57, 8.507059e+37 }
 0x221   : > { %v615_v50 = vpop.eup %614 }
 0x222   : > { %v345_v52 = vmul.f32 %v615_v50, %v340_v48  ;;  %vm350_vm4 = vweird.f32 %v615_v50  ;;  %v617_v3 = vpop.eup %616 }
 0x223   : > { %vm351_vm6 = vmor %vm349_vm5, %vm350_vm4  ;;  %v343_v6 = vadd.f32 1.0, %v617_v3 }
 0x224   : > { %v346_v53 = vsub.f32 1.0, %v345_v52 }
 0x225   : > { %vm394_vm13 = vweird.f32 %v343_v6  ;;  %v400_v37 = vand.u32 2147483648, %v343_v6 }
 0x226   : > { %v347_v56 = vmul.f32 %v615_v50, %v346_v53 }
 0x227   : > { %v401_v44 = vor.u32 1.1754944e-38, %v400_v37 }
 0x228   : > { %v348_v58 = vadd.f32 %v615_v50, %v347_v56 }
 0x22a   : > { %v352_v60 = vsel %vm351_vm6, %v615_v50, %v348_v58 }
 0x22b   : > { %v357_v61 = vsel %vm354_vm7, %v356_v59, %v352_v60 }
 0x22c   : > { %v315_v62 = vpop.permute.xlu0 %314  ;;  %406 = vperm.xlu0 %609, %v357_v61  }
 0x22d   : > { %v325_v63 = vadd.f32 %v315_v62, %v299_v40  ;;  %v398_v40 = vand.u32 2147483647, %v343_v6 }
 0x22f   : > { %v545_v4 = vmul.f32 -1.442695, %v325_v63  ;;  %vm399_vm3 = vcmp.eq.f32.partialorder %v398_v40, 8.507059e+37 }
 0x231   : > { %618 = vpow2.f32 %v545_v4 }
 0x232   : > { %620 = vrcp.f32 %v343_v6 }
 0x234   : > { %v317_v11 = vpop.permute.xlu1 %316 }
 0x235   : > { %v326_v12 = vadd.f32 %v317_v11, %v302_v42 }
 0x237   : > { %v619_v13 = vpop.eup %618  ;;  %v546_v14 = vmul.f32 -1.442695, %v326_v12 }
 0x238   : > { %v341_v15 = vadd.f32 1.0, %v619_v13  ;;  %v621_v16 = vpop.eup %620 }
 0x239   : > { %622 = vpow2.f32 %v546_v14  ;;  %v390_v18 = vmul.f32 %v621_v16, %v343_v6  ;;  %vm395_vm12 = vweird.f32 %v621_v16 }
 0x23a   : > { %624 = vrcp.f32 %v341_v15  ;;  %v370_v24 = vand.u32 2147483648, %v341_v15  ;;  %v368_v26 = vand.u32 2147483647, %v341_v15  ;;  %vm364_vm9 = vweird.f32 %v341_v15  ;;  %vm396_vm15 = vmor %vm394_vm13, %vm395_vm12 }
 0x23b   : > { %v391_v23 = vsub.f32 1.0, %v390_v18 }
 0x23c   : > { %v371_v30 = vor.u32 1.1754944e-38, %v370_v24  ;;  %vm369_vm11 = vcmp.eq.f32.partialorder %v368_v26, 8.507059e+37 }
 0x23d   : > { %v392_v28 = vmul.f32 %v621_v16, %v391_v23 }
 0x23f   : > { %v623_v17 = vpop.eup %622  ;;  %v393_v35 = vadd.f32 %v621_v16, %v392_v28 }
 0x240   : > { %v625_v19 = vpop.eup %624  ;;  %v342_v20 = vadd.f32 1.0, %v623_v17 }
 0x241   : > { %v360_v21 = vmul.f32 %v625_v19, %v341_v15  ;;  %vm365_vm8 = vweird.f32 %v625_v19  ;;  %v397_v42 = vsel %vm396_vm15, %v621_v16, %v393_v35 }
 0x242   : > { %626 = vrcp.f32 %v342_v20  ;;  %vm366_vm10 = vmor %vm364_vm9, %vm365_vm8  ;;  %v385_v36 = vand.u32 2147483648, %v342_v20  ;;  %v383_v39 = vand.u32 2147483647, %v342_v20  ;;  %vm379_vm0 = vweird.f32 %v342_v20 }
 0x243   : > { %v361_v22 = vsub.f32 1.0, %v360_v21  ;;  %v402_v47 = vsel %vm399_vm3, %v401_v44, %v397_v42 }
 0x244   : > { %v386_v43 = vor.u32 1.1754944e-38, %v385_v36  ;;  %vm384_vm2 = vcmp.eq.f32.partialorder %v383_v39, 8.507059e+37 }
 0x245   : > { %v362_v25 = vmul.f32 %v625_v19, %v361_v22 }
 0x247   : > { %v363_v27 = vadd.f32 %v625_v19, %v362_v25 }
 0x248   : > { %v627_v29 = vpop.eup %626 }
 0x249   : > { %v367_v31 = vsel %vm366_vm10, %v625_v19, %v363_v27  ;;  %v375_v32 = vmul.f32 %v627_v29, %v342_v20  ;;  %vm380_vm14 = vweird.f32 %v627_v29 }
 0x24a   : > { %v372_v33 = vsel %vm369_vm11, %v371_v30, %v367_v31  ;;  %vm381_vm1 = vmor %vm379_vm0, %vm380_vm14 }
 0x24b   : > { %411 = vperm.xlu2 %610, %v372_v33   ;;  %v376_v34 = vsub.f32 1.0, %v375_v32 }
 0x24d   : > { %v377_v38 = vmul.f32 %v627_v29, %v376_v34 }
 0x24f   : > { %v378_v41 = vadd.f32 %v627_v29, %v377_v38 }
 0x251   : > { %v382_v45 = vsel %vm381_vm1, %v627_v29, %v378_v41 }
 0x252   : > { %v387_v46 = vsel %vm384_vm2, %v386_v43, %v382_v45 }
 0x253   : > { %416 = vperm.xlu1 %611, %v387_v46   ;;  %421 = vperm.xlu2 %610, %v402_v47  }
 0x29e   : > { %v407_v48 = vpop.permute.xlu0 %406 }
 0x29f   : > { %v424_v49 = vmul.f32 %v407_v48, %v866_v9  ;;  %v425_v50 = vmul.f32 %v407_v48, %v868_v10 }
 0x2a1   : > { %432 = vst [vmem:[%s190_s27] sm:$0xff] %v424_v49 }
 0x2a2   : > { %433 = vst [vmem:[%s190_s27 + $0x8] sm:$0xff] %v425_v50 }
 0x2a5   : > { %v412_v51 = vpop.permute.xlu2 %411 }
 0x2a6   : > { %v426_v52 = vmul.f32 %v412_v51, %v862_v7  ;;  %v427_v53 = vmul.f32 %v412_v51, %v864_v8 }
 0x2a8   : > { %434 = vst [vmem:[%s190_s27 + $0x10] sm:$0xff] %v426_v52 }
 0x2a9   : > { %435 = vst [vmem:[%s190_s27 + $0x18] sm:$0xff] %v427_v53 }
 0x2ad   : > { %v422_v54 = vpop.permute.xlu2 %421 }
 0x2ae   : > { %v430_v55 = vmul.f32 %v422_v54, %v848_v0  ;;  %v431_v56 = vmul.f32 %v422_v54, %v850_v1 }
 0x2b0   : > { %438 = vst [vmem:[%s190_s27 + $0x30] sm:$0xff] %v430_v55 }
 0x2b1   : > { %439 = vst [vmem:[%s190_s27 + $0x38] sm:$0xff] %v431_v56 }
 0x2c5   : > { %v417_v7 = vpop.permute.xlu1 %416 }
 0x2c6   : > { %v428_v8 = vmul.f32 %v417_v7, %v852_v2  ;;  %v429_v9 = vmul.f32 %v417_v7, %v858_v5 }
 0x2c8   : > { %436 = vst [vmem:[%s190_s27 + $0x20] sm:$0xff] %v428_v8 }
 0x2c9   : > { %437 = vst [vmem:[%s190_s27 + $0x28] sm:$0xff] %v429_v9 }
 0x2ca   : > { %685 = shalt.err (!%p682_p4)
}
 0x2cb   : > { %s730_s29 = smov 256   ;;  %s731_s19 = smov 16  }
 0x2cc   : > { %559 = dma.vmem_to_hbm [thread:$0]  (%p802_p11), %s454_s6, 1024, %s456_s23, %s441_s5, %s730_s29, %s730_s29, %s731_s19  }
 0x2cd PF: > { %s470_s20 = sand.u32 1, %s712_s12   ;;  %p951_p7 = scmp.ge.s32.totalorder %s724_s15, 2 }
 0x2ce   : > { %s471_s22 = scalar_lea.sflag [#allocation4], %s470_s20 }
 0x2cf   : > { %p566_p5 = pnand %p951_p7, %p806_p12 }
 0x2d1   : > { %p567_p8 = pneg %p566_p5 }
 0x2d3   : > { %707 = dma.done.wait (%p567_p8), %s471_s22, 1024  }
 0x2d4   : > { %709 = vsyncadd (%p567_p8), %s471_s22, 4294966272  ;;  %p16_p10 = scmp.ge.s32.totalorder %s777_s18, 4   ;;  %s952_s12 = smov %s716_s13 }
 0x2d5   : > { %s953_s13 = smov %s720_s14  ;;  %s954_s14 = smov %s789_s21 }
 0x2d6   : > { %s955_s15 = smov %s777_s18  ;;  %18 = sbr.rel (!%p16_p10) target bundleno = 5 (0x5), region = 77 }
 0x2db   :  { %477 = vsyncpa [#allocation3], 1 }
 0x2dc   :  { %479 = vsyncpa [#allocation3 + $0x1], 1 }
 0x2dd   :  { %480 = vsyncpa [#allocation4], 1 }
 0x2de   :  { %482 = vsyncpa [#allocation4 + $0x1], 1 }

</bundles_post_ra>
